<compile_context>
chip_gen: v5e
topology: v5e:2x2
jax: 0.10.0
libtpu: 0.0.40
codegen_flags: <defaults>
</compile_context>

<pallas_src>
import functools

import jax
import jax.numpy as jnp
from jax.experimental import pallas as pl
from jax.experimental.pallas import tpu as pltpu

_MiB = 1024 * 1024
_MAX_PLANES_PER_STEP = 64   # bounds the static per-plane unroll / compile time


def bilinear_weight_matrix(in_size: int, out_size: int) -> jnp.ndarray:
    """Row-stochastic (out_size, in_size) matrix reproducing PyTorch's
    F.interpolate(mode='bilinear', align_corners=False, antialias=False)."""
    scale = in_size / out_size
    o = jnp.arange(out_size, dtype=jnp.float32)
    src = (o + 0.5) * scale - 0.5
    src = jnp.maximum(src, 0.0)          # PyTorch clamps negative source coords
    i0 = jnp.floor(src).astype(jnp.int32)
    i0 = jnp.minimum(i0, in_size - 1)
    i1 = jnp.minimum(i0 + 1, in_size - 1)
    frac = src - i0.astype(jnp.float32)
    rows = jnp.arange(out_size)
    w = jnp.zeros((out_size, in_size), dtype=jnp.float32)
    w = w.at[rows, i0].add(1.0 - frac)
    w = w.at[rows, i1].add(frac)
    return w


# --------------------------------------------------------------------------
# Kernels.
# --------------------------------------------------------------------------
def _resize_kernel_natural(x_ref, wh_ref, wwT_ref, o_ref, t_ref, *, b, h_in):
    """Natural-layout output path (W_out >= 128).

    x_ref  : (b*H_in, W_in)        input plane block
    wh_ref : (tile_Ho, H_in)       height-resize weights (f32)
    wwT_ref: (W_in, W_out)         width-resize weights, transposed (f32)
    o_ref  : (b, tile_Ho, W_out)   output block, natural layout
    t_ref  : (b*H_in, W_out) f32   scratch: width-resized planes (persists over j)
    """
    # Width pass: one big MXU matmul, run ONCE per plane block (shared across
    # all H_out tiles through the persistent scratch).
    @pl.when(pl.program_id(1) == 0)
    def _():
        t_ref[...] = jnp.dot(x_ref[...].astype(jnp.float32), wwT_ref[...],
                             preferred_element_type=jnp.float32)

    # Height pass: per-plane dot stored straight into the natural output
    # layout (live range = one plane; no scatter, no wrapper transpose).
    wh = wh_ref[...]
    for p in range(b):
        o_ref[p] = jnp.dot(wh, t_ref[p * h_in:(p + 1) * h_in, :],
                           preferred_element_type=jnp.float32).astype(o_ref.dtype)


def _resize_kernel_slab(x_ref, wh_ref, wwT_ref, o_ref, xs_ref, *, b, h_in):
    """Lane-dense slab output path (W_out < 128).

    x_ref  : (b*H_in, W_in)
    wh_ref : (tile_Ho, H_in)
    wwT_ref: (W_in, W_out)
    o_ref  : (1, tile_Ho, b*W_out)   lane-dense output slab
    xs_ref : (H_in, b*W_out) f32     width-resized planes packed along lanes
    """
    w_out = wwT_ref.shape[1]

    # Width pass, ONCE per plane block: per-plane dot written directly into its
    # lane slice of the scratch (no large live intermediate to spill).
    @pl.when(pl.program_id(1) == 0)
    def _():
        ww = wwT_ref[...]
        for p in range(b):
            xs_ref[:, p * w_out:(p + 1) * w_out] = jnp.dot(
                x_ref[p * h_in:(p + 1) * h_in, :].astype(jnp.float32), ww,
                preferred_element_type=jnp.float32)

    # Height pass: one lane-dense MXU matmul + one unmasked store.
    o_ref[0] = jnp.dot(wh_ref[...], xs_ref[...],
                       preferred_element_type=jnp.float32).astype(o_ref.dtype)


# --------------------------------------------------------------------------
# Static (trace-time) tiling heuristics.
# --------------------------------------------------------------------------
def _vmem_bytes(b, tile_ho, h_in, w_in, w_out, x_size):
    blocks = 2 * (b * h_in * w_in + b * tile_ho * w_out) * x_size    # double-buffered I/O
    weights = 2 * (tile_ho * h_in + w_in * w_out) * 4                # f32, double-buffered
    scratch = b * h_in * w_out * 4                                   # width-pass result
    live = (b * h_in * max(w_in, w_out) + b * tile_ho * w_out) * 4   # vreg/spill headroom
    return blocks + weights + scratch + live


def _choose_tiling(nc, h_in, w_in, h_out, w_out, x_size, sub_align, budget):
    """Pick (planes per step b, H_out tile). Largest b that fits the budget,
    preferring >= 2 plane blocks (megacore / v7x's two TensorCores)."""
    divisors = [d for d in range(1, nc + 1) if nc % d == 0]
    aligned = [d for d in divisors if (d * h_in) % sub_align == 0 or d == nc] or [nc]
    aligned = [d for d in aligned if d <= _MAX_PLANES_PER_STEP] or [min(aligned)]
    ho_cands = sorted({h_out} | {t for t in range(sub_align, h_out, sub_align)
                                 if h_out % t == 0}, reverse=True)

    def pick(cands):
        for d in sorted(cands, reverse=True):      # largest plane batch first
            for t in ho_cands:                      # then largest H_out tile
                if _vmem_bytes(d, t, h_in, w_in, w_out, x_size) <= budget:
                    return d, t
        return None

    multi = [d for d in aligned if nc // d >= 2]    # keep >= 2 parallel blocks
    choice = pick(multi) or pick(aligned)
    if choice is None:
        # TODO(synk): support non-divisor H_out tiles (masked last tile) instead of
        # potentially exceeding the budget for pathologically large outputs.
        choice = (min(aligned), min(ho_cands))
    return choice


# --------------------------------------------------------------------------
# Public wrapper.
# --------------------------------------------------------------------------
@functools.partial(jax.jit, static_argnames=("height", "width"))
def resize_layer(x: jnp.ndarray, height: int, width: int) -> jnp.ndarray:
    """Bilinear resize of NCHW input `x` to (height, width)."""
    n, c, h_in, w_in = x.shape
    nc = n * c
    out_dtype = x.dtype
    x_size = x.dtype.itemsize
    sub_align = 16 if x.dtype == jnp.bfloat16 else 8   # bf16 packs 16 sublanes/vreg

    # Generation-aware VMEM budgeting (v5e/v6e: 128 MiB physical, v7x: 64 MiB).
    try:
        vmem_cap = int(pltpu.get_tpu_info().vmem_capacity_bytes)
    except Exception:
        vmem_cap = 64 * _MiB
    budget = min(int(0.40 * vmem_cap), 56 * _MiB)        # tile-choice working-set target
    limit_cap = min(int(0.85 * vmem_cap), 112 * _MiB)    # compiler limit headroom

    b, tile_ho = _choose_tiling(nc, h_in, w_in, height, width, x_size, sub_align, budget)
    num_blocks = nc // b
    num_tiles = height // tile_ho

    # All opmath in f32 (tight parity with PyTorch fp32 opmath); bf16 only on I/O.
    # TODO(synk): optional bf16-weight fast path for compute-visible f32 upsizes
    # on v5e, gated behind a precision flag.
    wh = bilinear_weight_matrix(h_in, height)             # (H_out, H_in)  f32
    wwT = bilinear_weight_matrix(w_in, width).T           # (W_in, W_out)  f32
    x2 = x.reshape(nc * h_in, w_in)                       # free reshape

    est = _vmem_bytes(b, tile_ho, h_in, w_in, width, x_size)
    vmem_limit = int(min(max(est + 8 * _MiB, 32 * _MiB), limit_cap))

    flops = 2 * nc * (h_in * w_in * width + height * h_in * width)
    bytes_accessed = (nc * h_in * w_in + nc * height * width) * x_size \
        + (wh.size + wwT.size) * 4
    cost = pl.CostEstimate(flops=int(flops), transcendentals=0,
                           bytes_accessed=int(bytes_accessed))

    # TODO(synk): single-buffer the grid-invariant weight blocks
    # (pipeline_mode=pl.Buffered(1)) once verified on the target jax version;
    # double-buffered weights are already accounted for in the VMEM estimate.
    in_specs = [
        pl.BlockSpec((b * h_in, w_in), lambda i, j: (i, 0)),
        pl.BlockSpec((tile_ho, h_in), lambda i, j: (j, 0)),
        pl.BlockSpec((w_in, width), lambda i, j: (0, 0)),
    ]
    cparams = pltpu.CompilerParams(
        dimension_semantics=("parallel", "arbitrary"),
        vmem_limit_bytes=vmem_limit,
    )

    if width >= 128:
        # Natural-layout output: no scatter loop in-kernel, no HBM transpose outside.
        kernel = functools.partial(_resize_kernel_natural, b=b, h_in=h_in)
        out = pl.pallas_call(
            kernel,
            out_shape=jax.ShapeDtypeStruct((nc, height, width), out_dtype),
            grid_spec=pltpu.PrefetchScalarGridSpec(
                num_scalar_prefetch=0,
                grid=(num_blocks, num_tiles),
                in_specs=in_specs,
                out_specs=pl.BlockSpec((b, tile_ho, width), lambda i, j: (i, j, 0)),
                scratch_shapes=[pltpu.VMEM((b * h_in, width), jnp.float32)],
            ),
            compiler_params=cparams,
            cost_estimate=cost,
        )(x2, wh, wwT)
        return out.reshape(n, c, height, width)           # free reshape, no transpose

    # Slab path (width < 128): pack b planes along lanes for lane-dense stores.
    kernel = functools.partial(_resize_kernel_slab, b=b, h_in=h_in)
    out_slab = pl.pallas_call(
        kernel,
        out_shape=jax.ShapeDtypeStruct((num_blocks, height, b * width), out_dtype),
        grid_spec=pltpu.PrefetchScalarGridSpec(
            num_scalar_prefetch=0,
            grid=(num_blocks, num_tiles),
            in_specs=in_specs,
            out_specs=pl.BlockSpec((1, tile_ho, b * width), lambda i, j: (i, j, 0)),
            scratch_shapes=[pltpu.VMEM((h_in, b * width), jnp.float32)],
        ),
        compiler_params=cparams,
        cost_estimate=cost,
    )(x2, wh, wwT)

    # Undo the slab layout: (blocks, H_out, b*W_out) -> (N, C, H_out, W_out).
    out = out_slab.reshape(num_blocks, height, b, width)
    out = out.transpose(0, 2, 1, 3).reshape(n, c, height, width)
    return out


if __name__ == "__main__":
    key = jax.random.PRNGKey(0)
    N, C, H_IN, W_IN = 2, 4, 16, 16
    x = jax.random.normal(key, (N, C, H_IN, W_IN), dtype=jnp.float32)

    def reference(inp, h, w):
        wh = bilinear_weight_matrix(inp.shape[2], h)
        ww = bilinear_weight_matrix(inp.shape[3], w)
        return jnp.einsum("oh,nchw,pw->ncop", wh, inp.astype(jnp.float32), ww)

    # Case 1: upsample, narrow output width (< 128 lanes -> slab path).
    out1 = jax.block_until_ready(resize_layer(x, 24, 20))
    ref1 = reference(x, 24, 20)
    assert out1.shape == (N, C, 24, 20), out1.shape
    assert jnp.allclose(out1, ref1, atol=1e-5, rtol=1e-5), float(jnp.max(jnp.abs(out1 - ref1)))

    # Case 2: flipped aspect ratio (still slab path).
    out2 = jax.block_until_ready(resize_layer(x, 20, 24))
    ref2 = reference(x, 20, 24)
    assert out2.shape == (N, C, 20, 24), out2.shape
    assert jnp.allclose(out2, ref2, atol=1e-5, rtol=1e-5), float(jnp.max(jnp.abs(out2 - ref2)))

    # Case 3: downsample (no antialiasing, matching antialias=False).
    out3 = jax.block_until_ready(resize_layer(x, 8, 12))
    ref3 = reference(x, 8, 12)
    assert out3.shape == (N, C, 8, 12), out3.shape
    assert jnp.allclose(out3, ref3, atol=1e-5, rtol=1e-5), float(jnp.max(jnp.abs(out3 - ref3)))

    # Case 4: wide output (>= 128 lanes -> natural-layout path, no wrapper transpose).
    out4 = jax.block_until_ready(resize_layer(x, 32, 128))
    ref4 = reference(x, 32, 128)
    assert out4.shape == (N, C, 32, 128), out4.shape
    assert jnp.allclose(out4, ref4, atol=1e-5, rtol=1e-5), float(jnp.max(jnp.abs(out4 - ref4)))

    # Case 5: bf16 input (f32 opmath inside the kernel, bf16 I/O only).
    xb = x.astype(jnp.bfloat16)
    out5 = jax.block_until_ready(resize_layer(xb, 24, 20))
    assert out5.dtype == jnp.bfloat16
    assert jnp.allclose(out5.astype(jnp.float32), ref1, atol=5e-2, rtol=5e-2), float(
        jnp.max(jnp.abs(out5.astype(jnp.float32) - ref1)))

    print("KERNEL_OK")
</pallas_src>

<mosaic_0001>
module attributes {stable_mosaic.version = 11 : i64} {
  func.func @_resize_kernel_slab(%arg0: i32, %arg1: i32, %arg2: memref<64x16xf32, #tpu.memory_space<vmem>>, %arg3: memref<24x16xf32, #tpu.memory_space<vmem>>, %arg4: memref<16x20xf32, #tpu.memory_space<vmem>>, %arg5: memref<1x24x80xf32, #tpu.memory_space<vmem>>, %arg6: memref<16x80xf32, #tpu.memory_space<vmem>>) attributes {dimension_semantics = [#tpu.dimension_semantics<parallel>, #tpu.dimension_semantics<arbitrary>], iteration_bounds = array<i64: 2, 1>, scalar_prefetch = 0 : i64, scratch_operands = 1 : i64, tpu.core_type = #tpu.core_type<tc>, window_params = [{transform_indices = @transform_0, window_bounds = array<i64: 64, 16>}, {transform_indices = @transform_1, window_bounds = array<i64: 24, 16>}, {pipeline_mode = #tpu.pipeline_mode<synchronous>, transform_indices = @transform_2, window_bounds = array<i64: 16, 20>}, {transform_indices = @transform_3, window_bounds = array<i64: 1, 24, 80>}]} {
    %c0_i32 = arith.constant 0 : i32
    %0 = arith.cmpi eq, %arg1, %c0_i32 : i32
    %1 = arith.extui %0 : i1 to i32
    %c0_i32_0 = arith.constant 0 : i32
    %2 = arith.cmpi ne, %1, %c0_i32_0 : i32
    scf.if %2 {
      %c0_7 = arith.constant 0 : index
      %c0_8 = arith.constant 0 : index
      %9 = vector.load %arg4[%c0_7, %c0_8] : memref<16x20xf32, #tpu.memory_space<vmem>>, vector<16x20xf32>
      %c0_9 = arith.constant 0 : index
      %c0_10 = arith.constant 0 : index
      %10 = vector.load %arg2[%c0_9, %c0_10] : memref<64x16xf32, #tpu.memory_space<vmem>>, vector<16x16xf32>
      %cst_11 = arith.constant dense<0.000000e+00> : vector<16x20xf32>
      %11 = tpu.matmul %10, %9, %cst_11 {dimension_numbers = #tpu.dot_dimension_numbers<[1], [0], [0], [1], [0, 0, 1, 1], [], []>} : vector<16x16xf32>, vector<16x20xf32>, vector<16x20xf32> -> vector<16x20xf32>
      %c0_12 = arith.constant 0 : index
      %c0_13 = arith.constant 0 : index
      %12 = vector.load %arg6[%c0_12, %c0_13] : memref<16x80xf32, #tpu.memory_space<vmem>>, vector<16x20xf32>
      tpu.vector_store %arg6[%c0_12, %c0_13], %11 {strides = array<i32>} : memref<16x80xf32, #tpu.memory_space<vmem>>, vector<16x20xf32>,
      %c16 = arith.constant 16 : index
      %c0_14 = arith.constant 0 : index
      %13 = vector.load %arg2[%c16, %c0_14] : memref<64x16xf32, #tpu.memory_space<vmem>>, vector<16x16xf32>
      %cst_15 = arith.constant dense<0.000000e+00> : vector<16x20xf32>
      %14 = tpu.matmul %13, %9, %cst_15 {dimension_numbers = #tpu.dot_dimension_numbers<[1], [0], [0], [1], [0, 0, 1, 1], [], []>} : vector<16x16xf32>, vector<16x20xf32>, vector<16x20xf32> -> vector<16x20xf32>
      %c0_16 = arith.constant 0 : index
      %c20 = arith.constant 20 : index
      %15 = vector.load %arg6[%c0_16, %c20] : memref<16x80xf32, #tpu.memory_space<vmem>>, vector<16x20xf32>
      tpu.vector_store %arg6[%c0_16, %c20], %14 {strides = array<i32>} : memref<16x80xf32, #tpu.memory_space<vmem>>, vector<16x20xf32>,
      %c32 = arith.constant 32 : index
      %c0_17 = arith.constant 0 : index
      %16 = vector.load %arg2[%c32, %c0_17] : memref<64x16xf32, #tpu.memory_space<vmem>>, vector<16x16xf32>
      %cst_18 = arith.constant dense<0.000000e+00> : vector<16x20xf32>
      %17 = tpu.matmul %16, %9, %cst_18 {dimension_numbers = #tpu.dot_dimension_numbers<[1], [0], [0], [1], [0, 0, 1, 1], [], []>} : vector<16x16xf32>, vector<16x20xf32>, vector<16x20xf32> -> vector<16x20xf32>
      %c0_19 = arith.constant 0 : index
      %c40 = arith.constant 40 : index
      %18 = vector.load %arg6[%c0_19, %c40] : memref<16x80xf32, #tpu.memory_space<vmem>>, vector<16x20xf32>
      tpu.vector_store %arg6[%c0_19, %c40], %17 {strides = array<i32>} : memref<16x80xf32, #tpu.memory_space<vmem>>, vector<16x20xf32>,
      %c48 = arith.constant 48 : index
      %c0_20 = arith.constant 0 : index
      %19 = vector.load %arg2[%c48, %c0_20] : memref<64x16xf32, #tpu.memory_space<vmem>>, vector<16x16xf32>
      %cst_21 = arith.constant dense<0.000000e+00> : vector<16x20xf32>
      %20 = tpu.matmul %19, %9, %cst_21 {dimension_numbers = #tpu.dot_dimension_numbers<[1], [0], [0], [1], [0, 0, 1, 1], [], []>} : vector<16x16xf32>, vector<16x20xf32>, vector<16x20xf32> -> vector<16x20xf32>
      %c0_22 = arith.constant 0 : index
      %c60 = arith.constant 60 : index
      %21 = vector.load %arg6[%c0_22, %c60] : memref<16x80xf32, #tpu.memory_space<vmem>>, vector<16x20xf32>
      tpu.vector_store %arg6[%c0_22, %c60], %20 {strides = array<i32>} : memref<16x80xf32, #tpu.memory_space<vmem>>, vector<16x20xf32>,
    } else {
    }
    %c0 = arith.constant 0 : index
    %c0_1 = arith.constant 0 : index
    %3 = vector.load %arg3[%c0, %c0_1] : memref<24x16xf32, #tpu.memory_space<vmem>>, vector<24x16xf32>
    %c0_2 = arith.constant 0 : index
    %c0_3 = arith.constant 0 : index
    %4 = vector.load %arg6[%c0_2, %c0_3] : memref<16x80xf32, #tpu.memory_space<vmem>>, vector<16x80xf32>
    %cst = arith.constant dense<0.000000e+00> : vector<24x80xf32>
    %5 = tpu.matmul %3, %4, %cst {dimension_numbers = #tpu.dot_dimension_numbers<[1], [0], [0], [1], [0, 0, 1, 1], [], []>} : vector<24x16xf32>, vector<16x80xf32>, vector<24x80xf32> -> vector<24x80xf32>
    %c0_4 = arith.constant 0 : index
    %c0_5 = arith.constant 0 : index
    %c0_6 = arith.constant 0 : index
    %6 = vector.load %arg5[%c0_4, %c0_5, %c0_6] : memref<1x24x80xf32, #tpu.memory_space<vmem>>, vector<1x24x80xf32>
    %7 = vector.shape_cast %6 : vector<1x24x80xf32> to vector<24x80xf32>
    %8 = vector.shape_cast %5 : vector<24x80xf32> to vector<1x24x80xf32>
    tpu.vector_store %arg5[%c0_4, %c0_5, %c0_6], %8 {strides = array<i32>} : memref<1x24x80xf32, #tpu.memory_space<vmem>>, vector<1x24x80xf32>,
    return
  }
  func.func @transform_0(%arg0: i32, %arg1: i32) -> (i32, i32) {
    %c0_i32 = arith.constant 0 : i32
    %c0_i32_0 = arith.constant 0 : i32
    return %arg0, %c0_i32 : i32, i32
  }
  func.func @transform_1(%arg0: i32, %arg1: i32) -> (i32, i32) {
    %c0_i32 = arith.constant 0 : i32
    %c0_i32_0 = arith.constant 0 : i32
    return %arg1, %c0_i32 : i32, i32
  }
  func.func @transform_2(%arg0: i32, %arg1: i32) -> (i32, i32) {
    %c0_i32 = arith.constant 0 : i32
    %c0_i32_0 = arith.constant 0 : i32
    %c0_i32_1 = arith.constant 0 : i32
    return %c0_i32, %c0_i32_0 : i32, i32
  }
  func.func @transform_3(%arg0: i32, %arg1: i32) -> (i32, i32, i32) {
    %c0_i32 = arith.constant 0 : i32
    %c0_i32_0 = arith.constant 0 : i32
    return %arg0, %arg1, %c0_i32 : i32, i32, i32
  }
}

</mosaic_0001>

<bundles_post_ra>
// kernel: resize_layer.1
= control target key start
LH: loop header
LB: loop body
LE: loop exit
PB: predicated region body
PF: predicated region fallthrough
CT: control target
= control target key end

     0   :  { %s625_s12 = smov 0   ;;  %s627_s13 = smov 0   ;;  %s689_s0 = inlined_call_operand.vmem [shape: f32[128,16], index: 0, kind: input, shape index: {}]   ;;  %s690_s1 = inlined_call_operand.vmem [shape: f32[24,16], index: 1, kind: input, shape index: {}]   ;;  %s691_s2 = inlined_call_operand.vmem [shape: f32[16,20], index: 2, kind: input, shape index: {}]   ;;  %s692_s3 = inlined_call_operand.vmem [shape: f32[2,24,80], index: 3, kind: output, shape index: {}]  }
   0x1   :  { %s629_s14 = smov 0  }
   0x2 LB: > { %s25_s15 = sadd.s32 1, %s596_s13  ;;  %p531_p0 = scmp.ge.s32.totalorder %s600_s14, 1  ;;  %s600_s14 = sphi %s629_s14, %s13_s14   ;;  %s596_s13 = sphi %s627_s13, %s694_s13   ;;  %s592_s12 = sphi %s625_s12, %s693_s12  }
   0x3   : > { %p27_p1 = scmp.ge.s32.totalorder %s25_s15, 2  ;;  %p163_p2 = scmp.lt.s32.totalorder %s600_s14, 3 }
   0x5   : > { %s696_s15 = smov (%p27_p1, %s25_s15), 0  ;;  %p164_p3 = pnand %p531_p0, %p163_p2 }
   0x6   : > { %s532_s20 = sshll.u32 (!%p164_p3), %s592_s12, 3  ;;  %s602_s25 = smov (!%p164_p3), 20  }
   0x7   : > { %167 = sbr.rel (%p164_p3) target bundleno = 437 (0x1b5), region = 32  ;;  %p197_p4 = scmp.lt.s32.totalorder (!%p164_p3), %s532_s20, 15 }
   0x8   : > { %s603_s26 = smov (!%p164_p3), 40   ;;  %s604_s27 = smov (!%p164_p3), 60  }
   0x9   : > { %p209_p5 = scmp.lt.s32.totalorder (!%p164_p3), %s592_s12, 1 }
   0xc   : > { %v223_v0 = vld [vmem:[%s691_s2 + $0x8] sm:$0xff]  ;;  %v222_v1 = vld [vmem:[%s691_s2] sm:$0xff]  ;;  %s698_s20 = smov (!%p197_p4, %s532_s20), 15  ;;  %vm226_vm0 = vcmask 130048   ;;  %vm256_vm1 = vcmask 162816   ;;  %vm298_vm2 = vcmask 326816  }
   0xd   : > { %247 = vmatpush.msra.mxu1 %v223_v0  ;;  %548 = vmatpush.msra.mxu2 %v223_v0  ;;  %s533_s21 = sshll.u32 %s698_s20, 3  ;;  %vm340_vm3 = vcmask 490816   ;;  %vm382_vm4 = vcmask 654816   ;;  %v385_v25 = vld [vmem:[%s690_s1] sm:$0xff]  ;;  %v386_v27 = vld [vmem:[%s690_s1 + $0x8] sm:$0xff]  ;;  %v387_v28 = vld [vmem:[%s690_s1 + $0x10] sm:$0xff] }
   0xe   : > { %365 = vmatpush.msra.mxu3 %v223_v0  ;;  %s200_s24 = scalar_lea.vmem %s689_s0, %s533_s21  ;;  %s700_s12 = smov (!%p209_p5, %s592_s12), 1  ;;  %vm426_vm5 = vcmask 654336  }
   0xf   : > { %248 = vmatpush.msra.mxu1 %v222_v1  ;;  %549 = vmatpush.msra.mxu2 %v222_v1  ;;  %v224_v2 = vld [vmem:[%s200_s24] sm:$0xff]  ;;  %v225_v3 = vld [vmem:[%s200_s24 + $0x8] sm:$0xff]  ;;  %v343_v4 = vld [vmem:[%s200_s24 + $0x30] sm:$0xff]  ;;  %s550_s7 = smul.u32 24, %s700_s12 }
  0x10   : > { %366 = vmatpush.msra.mxu3 %v222_v1  ;;  %535 = vmatmul.msk.f32.vlgmr.msra.gmra.mxu1 %vm226_vm0, %v224_v2  ;;  %v259_v5 = vld [vmem:[%s200_s24 + $0x10] sm:$0xff]  ;;  %v301_v6 = vld [vmem:[%s200_s24 + $0x20] sm:$0xff]  ;;  %v344_v7 = vld [vmem:[%s200_s24 + $0x38] sm:$0xff] }
  0x11   : > { %281 = vmatpush.msrb.mxu1 %v223_v0  ;;  %323 = vmatpush.msrb.mxu2 %v223_v0  ;;  %v260_v8 = vld [vmem:[%s200_s24 + $0x18] sm:$0xff]  ;;  %v302_v9 = vld [vmem:[%s200_s24 + $0x28] sm:$0xff]  ;;  %s216_s10 = scalar_lea.vmem %s692_s3, %s550_s7 }
  0x12   : > { %536 = vmatmul.msk.f32.vlgmr.msra.gmra.mxu2 %vm226_vm0, %v225_v3  ;;  %541 = vmatmul.msk.f32.vlgmr.msra.gmra.mxu3 %vm226_vm0, %v343_v4 }
  0x13   : > { %282 = vmatpush.msrb.mxu1 %v222_v1  ;;  %324 = vmatpush.msrb.mxu2 %v222_v1 }
  0x18   : > { %537 = vmatmul.msk.f32.vlgmr.msrb.gmra.mxu1 %vm226_vm0, %v259_v5 }
  0x1a   : > { %539 = vmatmul.msk.f32.vlgmr.msrb.gmra.mxu2 %vm226_vm0, %v301_v6  ;;  %542 = vmatmul.msk.f32.gmra.mxu3 %vm226_vm0, %v344_v7 }
  0x20   : > { %538 = vmatmul.msk.f32.gmra.mxu1 %vm226_vm0, %v260_v8 }
  0x22   : > { %540 = vmatmul.msk.f32.gmra.mxu2 %vm226_vm0, %v302_v9 }
  0x8d   : > { %v250_v10 = vpop.f32.mrf.mxu1 }
  0x8e   : > { %257 = vst.msk [vmem:[#allocation2] sm:$0xff] %vm256_vm1, %v250_v10 }
  0x95   : > { %v253_v11 = vpop.f32.mrf.mxu2  ;;  %v368_v12 = vpop.f32.mrf.mxu3 }
  0x96   : > { %258 = vst.msk [vmem:[#allocation2 + $0x8] sm:$0xff] %vm256_vm1, %v253_v11  ;;  %v284_v13 = vpop.f32.mrf.mxu1 }
  0x97   : > { %292 = vrot.lane.b32.xlu1 %v284_v13, %s602_s25 }
  0x9d   : > { %v326_v14 = vpop.f32.mrf.mxu2  ;;  %v371_v15 = vpop.f32.mrf.mxu3 }
  0x9e   : > { %334 = vrot.lane.b32.xlu2 %v326_v14, %s603_s26  ;;  %v287_v16 = vpop.f32.mrf.mxu1 }
  0x9f   : > { %294 = vrot.lane.b32.xlu0 %v287_v16, %s602_s25  ;;  %378 = vrot.lane.b32.xlu1 %v371_v15, %s604_s27 }
  0xa5   : > { %v329_v17 = vpop.f32.mrf.mxu2 }
  0xa6   : > { %376 = vrot.lane.b32.xlu2 %v368_v12, %s604_s27 }
  0xa7   : > { %336 = vrot.lane.b32.xlu0 %v329_v17, %s603_s26 }
  0xf8   : > { %v335_v18 = vpop.permute.xlu2 %334 }
 0x100   : > { %v377_v20 = vpop.permute.xlu2 %376 }
 0x109   : > { %v293_v19 = vpop.permute.xlu1 %292 }
 0x10a   : > { %299 = vst.msk [vmem:[#allocation2] sm:$0xff] %vm298_vm2, %v293_v19 }
 0x10b   : > { %341 = vst.msk [vmem:[#allocation2] sm:$0xff] %vm340_vm3, %v335_v18 }
 0x10c   : > { %383 = vst.msk [vmem:[#allocation2] sm:$0xff] %vm382_vm4, %v377_v20 }
 0x111   : > { %v295_v21 = vpop.permute.xlu0 %294  ;;  %v379_v22 = vpop.permute.xlu1 %378 }
 0x112   : > { %300 = vst.msk [vmem:[#allocation2 + $0x8] sm:$0xff] %vm298_vm2, %v295_v21 }
 0x113   : > { %v388_v26 = vld [vmem:[#allocation2] sm:$0xff] }
 0x119   : > { %v337_v23 = vpop.permute.xlu0 %336 }
 0x11a   : > { %342 = vst.msk [vmem:[#allocation2 + $0x8] sm:$0xff] %vm340_vm3, %v337_v23 }
 0x11b   : > { %384 = vst.msk [vmem:[#allocation2 + $0x8] sm:$0xff] %vm382_vm4, %v379_v22 }
 0x122   : > { %v389_v24 = vld [vmem:[#allocation2 + $0x8] sm:$0xff] }
 0x123   : > { %414 = vmatpush.msra.mxu0 %v389_v24 }
 0x125   : > { %415 = vmatpush.msra.mxu0 %v388_v26 }
 0x126   : > { %543 = vmatmul.msk.f32.vlgmr.msra.gmra.mxu0 %vm226_vm0, %v385_v25 }
 0x12e   : > { %544 = vmatmul.msk.f32.gmra.mxu0 %vm226_vm0, %v386_v27 }
 0x136   : > { %545 = vmatmul.msk.f32.gmra.mxu0 %vm226_vm0, %v387_v28 }
 0x1a3   : > { %v417_v29 = vpop.f32.mrf.mxu0 }
 0x1a4   : > { %427 = vst.msk [vmem:[%s216_s10] sm:$0xff] %vm426_vm5, %v417_v29 }
 0x1ab   : > { %v420_v30 = vpop.f32.mrf.mxu0 }
 0x1ac   : > { %428 = vst.msk [vmem:[%s216_s10 + $0x8] sm:$0xff] %vm426_vm5, %v420_v30 }
 0x1b3   : > { %v423_v31 = vpop.f32.mrf.mxu0 }
 0x1b4   : > { %429 = vst.msk [vmem:[%s216_s10 + $0x10] sm:$0xff] %vm426_vm5, %v423_v31 }
 0x1b5 PF: > { %s13_s14 = sadd.s32 1, %s600_s14   ;;  %s693_s12 = smov %s596_s13 }
 0x1b6   : > { %p10_p6 = scmp.ge.s32.totalorder %s13_s14, 4   ;;  %s694_s13 = smov %s696_s15 }
 0x1b8   :  { %12 = sbr.rel (!%p10_p6) target bundleno = 2 (0x2), region = 69 }

</bundles_post_ra>
